<compile_context>
chip_gen: v5e
topology: v5e:2x2
jax: 0.10.0
libtpu: 0.0.40
codegen_flags: <defaults>
</compile_context>

<pallas_src>
import jax
import jax.numpy as jnp
from jax.experimental import pallas as pl
from jax.experimental.pallas import tpu as pltpu


# ---------------------------------------------------------------------------
# Layer 1 kernel: H = relu((A @ X) @ W1 + b1)
# grid = (row tiles, reduction tiles); reduction axis last ("arbitrary").
# ---------------------------------------------------------------------------
def gcn_layer1_kernel(a_ref, x_ref, w1_ref, b1_ref, h_ref, acc_ref):
    k = pl.program_id(1)

    @pl.when(k == 0)
    def _():
        acc_ref[...] = jnp.zeros_like(acc_ref)

    # (tile, tile) bf16 @ (tile, F) bf16  -> f32 accumulate   (the O(N^2) part)
    acc_ref[...] += jnp.dot(a_ref[...], x_ref[...],
                            preferred_element_type=jnp.float32)

    @pl.when(k == pl.num_programs(1) - 1)
    def _():
        # small dense epilogue, f32 math, fused in-kernel
        z = jnp.dot(acc_ref[...], w1_ref[...],
                    preferred_element_type=jnp.float32) + b1_ref[...]
        h_ref[...] = jnp.maximum(z, 0.0).astype(h_ref.dtype)

    # F.dropout(x, training=self.training): identity in eval mode.
    # TODO(synk): add stochastic dropout via pltpu.prng_random_bits if a
    #             training-mode kernel is ever needed.


# ---------------------------------------------------------------------------
# Layer 2 kernel: out = log_softmax(A @ (H @ W2) + b2, axis=1)
# ---------------------------------------------------------------------------
def gcn_layer2_kernel(a_ref, h_ref, w2_ref, b2_ref, o_ref, acc_ref):
    k = pl.program_id(1)

    @pl.when(k == 0)
    def _():
        acc_ref[...] = jnp.zeros_like(acc_ref)

    # narrow per-block dense matmul (tile, H) @ (H, C), then aggregate with A
    p = jnp.dot(h_ref[...], w2_ref[...], preferred_element_type=jnp.float32)
    acc_ref[...] += jnp.dot(a_ref[...], p.astype(jnp.bfloat16),
                            preferred_element_type=jnp.float32)

    @pl.when(k == pl.num_programs(1) - 1)
    def _():
        z = acc_ref[...] + b2_ref[...]
        m = jnp.max(z, axis=1, keepdims=True)
        zs = z - m
        lse = jnp.log(jnp.sum(jnp.exp(zs), axis=1, keepdims=True))
        o_ref[...] = zs - lse


# ---------------------------------------------------------------------------
# Wrapper
# ---------------------------------------------------------------------------
def simple_gcn_forward(x, a_hat, w1, b1, w2, b2, *, tile_n=128):
    n, f = x.shape
    hdim = w1.shape[1]
    c = w2.shape[1]

    n_pad = int(pl.cdiv(n, tile_n)) * tile_n
    grid = (n_pad // tile_n, n_pad // tile_n)

    # Pad to the tile grid (zero rows/cols are inert) and cast the big
    # aggregation operands to bf16 (MXU-native); weights/bias stay f32.
    a_p = jnp.pad(a_hat, ((0, n_pad - n), (0, n_pad - n))).astype(jnp.bfloat16)
    x_p = jnp.pad(x, ((0, n_pad - n), (0, 0))).astype(jnp.bfloat16)
    w2_b = w2.astype(jnp.bfloat16)

    cparams = pltpu.CompilerParams(
        dimension_semantics=("parallel", "arbitrary"),
        vmem_limit_bytes=32 * 1024 * 1024,
    )

    # ---- layer 1: H = relu((A @ X) @ W1 + b1) ----
    h = pl.pallas_call(
        gcn_layer1_kernel,
        out_shape=jax.ShapeDtypeStruct((n_pad, hdim), jnp.bfloat16),
        grid_spec=pltpu.PrefetchScalarGridSpec(
            num_scalar_prefetch=0,
            grid=grid,
            in_specs=[
                pl.BlockSpec((tile_n, tile_n), lambda i, k: (i, k)),  # A tile
                pl.BlockSpec((tile_n, f), lambda i, k: (k, 0)),       # X tile
                pl.BlockSpec((f, hdim), lambda i, k: (0, 0)),         # W1 (resident)
                pl.BlockSpec((1, hdim), lambda i, k: (0, 0)),         # b1 (resident)
            ],
            out_specs=pl.BlockSpec((tile_n, hdim), lambda i, k: (i, 0)),
            scratch_shapes=[pltpu.VMEM((tile_n, f), jnp.float32)],
        ),
        compiler_params=cparams,
    )(a_p, x_p, w1, b1)

    # ---- layer 2: out = log_softmax(A @ (H @ W2) + b2) ----
    out_p = pl.pallas_call(
        gcn_layer2_kernel,
        out_shape=jax.ShapeDtypeStruct((n_pad, c), jnp.float32),
        grid_spec=pltpu.PrefetchScalarGridSpec(
            num_scalar_prefetch=0,
            grid=grid,
            in_specs=[
                pl.BlockSpec((tile_n, tile_n), lambda i, k: (i, k)),  # A tile
                pl.BlockSpec((tile_n, hdim), lambda i, k: (k, 0)),    # H tile
                pl.BlockSpec((hdim, c), lambda i, k: (0, 0)),         # W2 (resident)
                pl.BlockSpec((1, c), lambda i, k: (0, 0)),            # b2 (resident)
            ],
            out_specs=pl.BlockSpec((tile_n, c), lambda i, k: (i, 0)),
            scratch_shapes=[pltpu.VMEM((tile_n, c), jnp.float32)],
        ),
        compiler_params=cparams,
    )(a_p, h, w2_b, b2)

    return out_p[:n]


def build_normalized_adjacency(edge_index, num_nodes):
    """Dense D^{-1/2}(A + I)D^{-1/2} matching GCNConv defaults.

    Uses scatter-add so duplicated edges accumulate exactly like PyG's
    message passing (one message per edge occurrence).
    """
    src, dst = edge_index[0], edge_index[1]
    a = jnp.zeros((num_nodes, num_nodes), jnp.float32)
    a = a.at[dst, src].add(1.0)                        # out[dst] += x[src]
    a = a + jnp.eye(num_nodes, dtype=jnp.float32)      # self-loops
    deg = jnp.sum(a, axis=1)
    dinv = jnp.where(deg > 0, 1.0 / jnp.sqrt(deg), 0.0)
    return dinv[:, None] * a * dinv[None, :]


def gcn_reference(x, a_hat, w1, b1, w2, b2):
    """Pure-JAX f32 reference with the original PyG ordering A @ (X @ W)."""
    h = jnp.maximum(a_hat @ (x @ w1) + b1, 0.0)
    z = a_hat @ (h @ w2) + b2
    return jax.nn.log_softmax(z, axis=1)


if __name__ == "__main__":
    key = jax.random.PRNGKey(0)
    num_nodes = 200          # pads to 256 -> 2x2 grid with 128-tiles
    num_features = 8
    hidden = 16              # GCNConv(num_features, 16)
    num_classes = 4

    k_x, k_w1, k_w2 = jax.random.split(key, 3)

    # node features
    x = jax.random.normal(k_x, (num_nodes, num_features), jnp.float32)

    # deterministic undirected edge set (ring + chords), shape (2, E), no dups
    i = jnp.arange(num_nodes)
    ring_src = jnp.concatenate([i, (i + 1) % num_nodes])
    ring_dst = jnp.concatenate([(i + 1) % num_nodes, i])
    chord = jnp.arange(0, num_nodes, 5)
    chord_src = jnp.concatenate([chord, (chord + 7) % num_nodes])
    chord_dst = jnp.concatenate([(chord + 7) % num_nodes, chord])
    edge_index = jnp.stack(
        [jnp.concatenate([ring_src, chord_src]),
         jnp.concatenate([ring_dst, chord_dst])]
    ).astype(jnp.int32)

    a_hat = build_normalized_adjacency(edge_index, num_nodes)

    # deterministic parameter init (glorot-ish scaling; synthetic, not a checkpoint)
    w1 = jax.random.normal(k_w1, (num_features, hidden), jnp.float32) * (
        1.0 / jnp.sqrt(num_features)
    )
    b1 = jnp.zeros((1, hidden), jnp.float32)
    w2 = jax.random.normal(k_w2, (hidden, num_classes), jnp.float32) * (
        1.0 / jnp.sqrt(hidden)
    )
    b2 = jnp.zeros((1, num_classes), jnp.float32)

    out = simple_gcn_forward(x, a_hat, w1, b1, w2, b2, tile_n=128)
    jax.block_until_ready(out)

    # sanity: shape, rows of exp(log_softmax) sum to 1, and tolerance check
    # against a pure-JAX f32 reference (bf16 aggregation => small rounding diff)
    assert out.shape == (num_nodes, num_classes)
    row_sums = jnp.exp(out).sum(axis=1)
    assert bool(jnp.all(jnp.abs(row_sums - 1.0) < 1e-3))
    ref = gcn_reference(x, a_hat, w1, b1, w2, b2)
    max_err = float(jnp.max(jnp.abs(out - ref)))
    assert max_err < 1e-1, f"max |out - ref| = {max_err}"

    print("KERNEL_OK")
</pallas_src>

<mosaic_0001>
module attributes {stable_mosaic.version = 11 : i64} {
  func.func @gcn_layer1_kernel(%arg0: i32, %arg1: i32, %arg2: memref<128x128xbf16, #tpu.memory_space<vmem>>, %arg3: memref<128x8xbf16, #tpu.memory_space<vmem>>, %arg4: memref<8x16xf32, #tpu.memory_space<vmem>>, %arg5: memref<1x16xf32, #tpu.memory_space<vmem>>, %arg6: memref<128x16xbf16, #tpu.memory_space<vmem>>, %arg7: memref<128x8xf32, #tpu.memory_space<vmem>>) attributes {dimension_semantics = [#tpu.dimension_semantics<parallel>, #tpu.dimension_semantics<arbitrary>], iteration_bounds = array<i64: 2, 2>, scalar_prefetch = 0 : i64, scratch_operands = 1 : i64, tpu.core_type = #tpu.core_type<tc>, window_params = [{transform_indices = @transform_0, window_bounds = array<i64: 128, 128>}, {transform_indices = @transform_1, window_bounds = array<i64: 128, 8>}, {pipeline_mode = #tpu.pipeline_mode<synchronous>, transform_indices = @transform_2, window_bounds = array<i64: 8, 16>}, {pipeline_mode = #tpu.pipeline_mode<synchronous>, transform_indices = @transform_3, window_bounds = array<i64: 1, 16>}, {transform_indices = @transform_4, window_bounds = array<i64: 128, 16>}]} {
    %c0_i32 = arith.constant 0 : i32
    %0 = arith.cmpi eq, %arg1, %c0_i32 : i32
    %1 = arith.extui %0 : i1 to i32
    %c0_i32_0 = arith.constant 0 : i32
    %2 = arith.cmpi ne, %1, %c0_i32_0 : i32
    scf.if %2 {
      %cst_9 = arith.constant 0.000000e+00 : f32
      %12 = vector.broadcast %cst_9 : f32 to vector<128x8xf32>
      %c0_10 = arith.constant 0 : index
      %c0_11 = arith.constant 0 : index
      %13 = vector.load %arg7[%c0_10, %c0_11] : memref<128x8xf32, #tpu.memory_space<vmem>>, vector<128x8xf32>
      tpu.vector_store %arg7[%c0_10, %c0_11], %12 {strides = array<i32>} : memref<128x8xf32, #tpu.memory_space<vmem>>, vector<128x8xf32>,
    } else {
    }
    %c0 = arith.constant 0 : index
    %c0_1 = arith.constant 0 : index
    %3 = vector.load %arg7[%c0, %c0_1] : memref<128x8xf32, #tpu.memory_space<vmem>>, vector<128x8xf32>
    %c0_2 = arith.constant 0 : index
    %c0_3 = arith.constant 0 : index
    %4 = vector.load %arg2[%c0_2, %c0_3] : memref<128x128xbf16, #tpu.memory_space<vmem>>, vector<128x128xbf16>
    %c0_4 = arith.constant 0 : index
    %c0_5 = arith.constant 0 : index
    %5 = vector.load %arg3[%c0_4, %c0_5] : memref<128x8xbf16, #tpu.memory_space<vmem>>, vector<128x8xbf16>
    %cst = arith.constant dense<0.000000e+00> : vector<128x8xf32>
    %6 = tpu.matmul %4, %5, %cst {dimension_numbers = #tpu.dot_dimension_numbers<[1], [0], [0], [1], [0, 0, 1, 1], [], []>} : vector<128x128xbf16>, vector<128x8xbf16>, vector<128x8xf32> -> vector<128x8xf32>
    %7 = arith.addf %3, %6 : vector<128x8xf32>
    %c0_6 = arith.constant 0 : index
    %c0_7 = arith.constant 0 : index
    %8 = vector.load %arg7[%c0_6, %c0_7] : memref<128x8xf32, #tpu.memory_space<vmem>>, vector<128x8xf32>
    tpu.vector_store %arg7[%c0_6, %c0_7], %7 {strides = array<i32>} : memref<128x8xf32, #tpu.memory_space<vmem>>, vector<128x8xf32>,
    %c1_i32 = arith.constant 1 : i32
    %9 = arith.cmpi eq, %arg1, %c1_i32 : i32
    %10 = arith.extui %9 : i1 to i32
    %c0_i32_8 = arith.constant 0 : i32
    %11 = arith.cmpi ne, %10, %c0_i32_8 : i32
    scf.if %11 {
      %c0_9 = arith.constant 0 : index
      %c0_10 = arith.constant 0 : index
      %12 = vector.load %arg7[%c0_9, %c0_10] : memref<128x8xf32, #tpu.memory_space<vmem>>, vector<128x8xf32>
      %c0_11 = arith.constant 0 : index
      %c0_12 = arith.constant 0 : index
      %13 = vector.load %arg4[%c0_11, %c0_12] : memref<8x16xf32, #tpu.memory_space<vmem>>, vector<8x16xf32>
      %cst_13 = arith.constant dense<0.000000e+00> : vector<128x16xf32>
      %14 = tpu.matmul %12, %13, %cst_13 {dimension_numbers = #tpu.dot_dimension_numbers<[1], [0], [0], [1], [0, 0, 1, 1], [], []>} : vector<128x8xf32>, vector<8x16xf32>, vector<128x16xf32> -> vector<128x16xf32>
      %c0_14 = arith.constant 0 : index
      %c0_15 = arith.constant 0 : index
      %15 = vector.load %arg5[%c0_14, %c0_15] : memref<1x16xf32, #tpu.memory_space<vmem>>, vector<1x16xf32>
      %16 = vector.broadcast %15 : vector<1x16xf32> to vector<128x16xf32>
      %17 = arith.addf %14, %16 : vector<128x16xf32>
      %cst_16 = arith.constant 0.000000e+00 : f32
      %18 = vector.broadcast %cst_16 : f32 to vector<128x16xf32>
      %19 = arith.maximumf %17, %18 : vector<128x16xf32>
      %20 = arith.truncf %19 : vector<128x16xf32> to vector<128x16xbf16>
      %c0_17 = arith.constant 0 : index
      %c0_18 = arith.constant 0 : index
      %21 = vector.load %arg6[%c0_17, %c0_18] : memref<128x16xbf16, #tpu.memory_space<vmem>>, vector<128x16xbf16>
      tpu.vector_store %arg6[%c0_17, %c0_18], %20 {strides = array<i32>} : memref<128x16xbf16, #tpu.memory_space<vmem>>, vector<128x16xbf16>,
    } else {
    }
    return
  }
  func.func @transform_0(%arg0: i32, %arg1: i32) -> (i32, i32) {
    %c0_i32 = arith.constant 0 : i32
    return %arg0, %arg1 : i32, i32
  }
  func.func @transform_1(%arg0: i32, %arg1: i32) -> (i32, i32) {
    %c0_i32 = arith.constant 0 : i32
    %c0_i32_0 = arith.constant 0 : i32
    return %arg1, %c0_i32 : i32, i32
  }
  func.func @transform_2(%arg0: i32, %arg1: i32) -> (i32, i32) {
    %c0_i32 = arith.constant 0 : i32
    %c0_i32_0 = arith.constant 0 : i32
    %c0_i32_1 = arith.constant 0 : i32
    return %c0_i32, %c0_i32_0 : i32, i32
  }
  func.func @transform_3(%arg0: i32, %arg1: i32) -> (i32, i32) {
    %c0_i32 = arith.constant 0 : i32
    %c0_i32_0 = arith.constant 0 : i32
    %c0_i32_1 = arith.constant 0 : i32
    return %c0_i32, %c0_i32_0 : i32, i32
  }
  func.func @transform_4(%arg0: i32, %arg1: i32) -> (i32, i32) {
    %c0_i32 = arith.constant 0 : i32
    %c0_i32_0 = arith.constant 0 : i32
    return %arg0, %c0_i32 : i32, i32
  }
}

</mosaic_0001>

<bundles_post_ra>
// kernel: tpu_custom_call.1
= control target key start
LH: loop header
LB: loop body
LE: loop exit
PB: predicated region body
PF: predicated region fallthrough
CT: control target
= control target key end

     0   :  { %9 = vsyncpa [#allocation4], 0  ;;  %s1376_s0 = inlined_call_operand.hbm [shape: bf16[256,256], index: 0, kind: input, shape index: {}]   ;;  %s1377_s1 = inlined_call_operand.vmem [shape: bf16[256,8], index: 1, kind: input, shape index: {}]   ;;  %s1378_s2 = inlined_call_operand.vmem [shape: f32[8,16], index: 2, kind: input, shape index: {}]   ;;  %s1379_s3 = inlined_call_operand.vmem [shape: f32[1,16], index: 3, kind: input, shape index: {}]   ;;  %s1380_s4 = inlined_call_operand.vmem [shape: bf16[256,16], index: 4, kind: output, shape index: {}]  }
   0x1   :  { %11 = vsyncpa [#allocation4 + $0x1], 0  ;;  %s1132_s15 = smov 0   ;;  %s1134_s16 = smov 0  }
   0x2   :  { %s1136_s17 = smov 0   ;;  %s1138_s18 = smov 0  }
   0x3   :  { %s1140_s19 = smov 0   ;;  %s1142_s20 = smov 0  }
   0x4   :  { %s1144_s21 = smov 0   ;;  %s1146_s22 = smov 0  }
   0x5 LB: > { %s787_s23 = sadd.s32 4294967295, %s1101_s22   ;;  %s26_s24 = sadd.s32 1, %s1093_s20  ;;  %s1101_s22 = sphi %s1146_s22, %s17_s22   ;;  %s1097_s21 = sphi %s1144_s21, %s1392_s21   ;;  %s1093_s20 = sphi %s1142_s20, %s1391_s20   ;;  %s1089_s19 = sphi %s1140_s19, %s1390_s19   ;;  %s1085_s18 = sphi %s1138_s18, %s1389_s18   ;;  %s1081_s17 = sphi %s1136_s17, %s1388_s17   ;;  %s1077_s16 = sphi %s1134_s16, %s1387_s16   ;;  %s1073_s15 = sphi %s1132_s15, %s1386_s15  }
   0x6   : > { %p27_p0 = scmp.ge.s32.totalorder %s26_s24, 2  ;;  %s29_s25 = sadd.s32 1, %s1097_s21 }
   0x7   : > { %s38_s26 = sadd.s32 1, %s1081_s17  ;;  %p45_p1 = scmp.ne.s32.totalorder %s1081_s17, %s1077_s16 }
   0x8   : > { %s1394_s24 = smov (%p27_p0, %s26_s24), 0  ;;  %s1396_s25 = smov (!%p27_p0, %s29_s25), %s1097_s21 }
   0x9   : > { %s34_s27 = ssub.s32 %s1093_s20, %s1394_s24  ;;  %p46_p2 = scmp.eq.s32.totalorder %s1101_s22, 0 }
   0xa   : > { %p31_p3 = scmp.ge.s32.totalorder %s1396_s25, 2  ;;  %p51_p4 = scmp.ne.s32.totalorder %s1077_s16, %s1073_s15 }
   0xb   : > { %p1183_p5 = por %p46_p2, %p45_p1  ;;  %p52_p6 = scmp.eq.s32.totalorder %s787_s23, 0 }
   0xc   : > { %s1398_s25 = smov (%p31_p3, %s1396_s25), 0  ;;  %p935_p8 = scmp.lt.s32.totalorder %s1101_s22, 4 }
   0xd   : > { %1383 = sst [smem:[#allocation6_spill]] %s1398_s25  ;;  %p1189_p7 = por %p52_p6, %p51_p4 }
   0xe   : > { %s33_s30 = ssub.s32 %s1097_s21, %s1398_s25  ;;  %s175_s6 = sand.u32 1, %s1081_s17  }
   0xf   : > { %s35_s5 = sor.u32 %s34_s27, %s33_s30  ;;  %s791_s7 = sshll.u32 %s175_s6, 6 }
  0x10   : > { %p36_p9 = scmp.eq.s32.totalorder %s35_s5, 0  ;;  %s885_s8 = sshll.u32 %s1097_s21, 5 }
  0x11   : > { %s184_s10 = sadd.s32 %s1093_s20, %s885_s8  ;;  %s179_s12 = scalar_lea.vmem [#allocation3], %s791_s7 }
  0x12   : > { %s1199_s9 = scalar_select %p36_p9, %s1081_s17, %s38_s26  }
  0x13   : > { %s794_s11 = sshll.u32 %s184_s10, 2  ;;  %s189_s13 = sshll.u32 %s179_s12, 4  ;;  %s190_s13 = int_to_ptr.vmem [resolvable:$true] %s189_s13 }
  0x14   : > { %s186_s23 = scalar_lea.hbm %s1376_s0, %s794_s11  ;;  %p932_p10 = pnand %p935_p8, %p1183_p5 }
  0x15   : > { %s187_s25 = sshll.u32 %s186_s23, 4  ;;  %p795_p11 = scmp.ge.s32.totalorder %s1101_s22, 1  ;;  %s188_s25 = int_to_ptr.hbm [resolvable:$true] %s187_s25 }
  0x16   : > { %s176_s27 = scalar_lea.sflag [#allocation4], %s175_s6  ;;  %s1103_s30 = smov 128  }
  0x17   : > { %s1104_s26 = smov 64   ;;  %s1105_s5 = smov 4  }
  0x18   : > { %934 = dma.hbm_to_vmem [thread:$0]  (!%p932_p10), %s188_s25, 1024, %s190_s13, %s176_s27, %s1103_s30, %s1104_s26, %s1105_s5  }
  0x19   : > { %p206_p12 = scmp.lt.s32.totalorder %s1101_s22, 5 }
  0x1b   : > { %p207_p13 = pnand %p795_p11, %p206_p12 }
  0x1c   : > { %s212_s7 = sand.u32 (!%p207_p13), 1, %s1077_s16  }
  0x1d   : > { %210 = sbr.rel (%p207_p13) target bundleno = 422 (0x1a6), region = 36  ;;  %s796_s8 = sshll.u32 (!%p207_p13), %s212_s7, 6 }
  0x1e   : > { %s213_s10 = scalar_lea.sflag (!%p207_p13), [#allocation4], %s212_s7  ;;  %s1212_s11 = scalar_lea.vmem (!%p207_p13), [#allocation3], %s796_s8 }
  0x22   : > { %1068 = dma.done.wait (%p1189_p7), %s213_s10, 1024  }
  0x23   : > { %1070 = vsyncadd (%p1189_p7), %s213_s10, 4294966272  ;;  %s797_s28 = sshll.u32 %s1085_s18, 4  ;;  %s799_s6 = sshll.u32 %s1089_s19, 4 }
  0x24   : > { %p249_p0 = scmp.lt.s32.totalorder %s797_s28, 31  ;;  %p255_p1 = scmp.lt.s32.totalorder %s799_s6, 31 }
  0x25   : > { %p801_p2 = scmp.ne.s32.totalorder %s1085_s18, 0 }
  0x26   : > { %s1400_s28 = smov (!%p249_p0, %s797_s28), 31  ;;  %s1402_s6 = smov (!%p255_p1, %s799_s6), 31 }
  0x27   : > { %s798_s25 = sshll.u32 %s1400_s28, 2  ;;  %s800_s15 = sshll.u32 %s1402_s6, 2 }
  0x28   : > { %s1223_s14 = scalar_lea.vmem %s1377_s1, %s798_s25  ;;  %s1228_s29 = scalar_lea.vmem %s1380_s4, %s800_s15 }
  0x29   : > { %263 = sbr.rel (%p801_p2) target bundleno = 63 (0x3f), region = 44 }
  0x2e   : > { %vm264_vm0 = vcmask 64512   ;;  %v1106_v0 = vmov 0.0  }
  0x2f   : > { %265 = vst.msk [vmem:[#allocation2] sm:$0xff] %vm264_vm0, %v1106_v0 }
  0x30   : > { %266 = vst.msk [vmem:[#allocation2 + $0x8] sm:$0xff] %vm264_vm0, %v1106_v0 }
  0x31   : > { %267 = vst.msk [vmem:[#allocation2 + $0x10] sm:$0xff] %vm264_vm0, %v1106_v0 }
  0x32   : > { %268 = vst.msk [vmem:[#allocation2 + $0x18] sm:$0xff] %vm264_vm0, %v1106_v0 }
  0x33   : > { %269 = vst.msk [vmem:[#allocation2 + $0x20] sm:$0xff] %vm264_vm0, %v1106_v0 }
  0x34   : > { %270 = vst.msk [vmem:[#allocation2 + $0x28] sm:$0xff] %vm264_vm0, %v1106_v0 }
  0x35   : > { %271 = vst.msk [vmem:[#allocation2 + $0x30] sm:$0xff] %vm264_vm0, %v1106_v0 }
  0x36   : > { %272 = vst.msk [vmem:[#allocation2 + $0x38] sm:$0xff] %vm264_vm0, %v1106_v0 }
  0x37   : > { %273 = vst.msk [vmem:[#allocation2 + $0x40] sm:$0xff] %vm264_vm0, %v1106_v0 }
  0x38   : > { %274 = vst.msk [vmem:[#allocation2 + $0x48] sm:$0xff] %vm264_vm0, %v1106_v0 }
  0x39   : > { %275 = vst.msk [vmem:[#allocation2 + $0x50] sm:$0xff] %vm264_vm0, %v1106_v0 }
  0x3a   : > { %276 = vst.msk [vmem:[#allocation2 + $0x58] sm:$0xff] %vm264_vm0, %v1106_v0 }
  0x3b   : > { %277 = vst.msk [vmem:[#allocation2 + $0x60] sm:$0xff] %vm264_vm0, %v1106_v0 }
  0x3c   : > { %278 = vst.msk [vmem:[#allocation2 + $0x68] sm:$0xff] %vm264_vm0, %v1106_v0 }
  0x3d   : > { %279 = vst.msk [vmem:[#allocation2 + $0x70] sm:$0xff] %vm264_vm0, %v1106_v0 }
  0x3e   : > { %280 = vst.msk [vmem:[#allocation2 + $0x78] sm:$0xff] %vm264_vm0, %v1106_v0 }
  0x3f PF: > { %v901_v1 = vld [vmem:[%s1223_s14 + $0x38] sm:$0xff]  ;;  %v900_v2 = vld [vmem:[%s1223_s14 + $0x30] sm:$0xff]  ;;  %v899_v3 = vld [vmem:[%s1223_s14 + $0x28] sm:$0xff]  ;;  %vm490_vm1 = vcmask 64512   ;;  %p866_p3 = scmp.ne.s32.totalorder %s1085_s18, 1 }
  0x40   : > { %425 = vmatpush.bf16.msra.mxu0 %v901_v1  ;;  %902 = vmatpush.bf16.msra.mxu1 %v901_v1  ;;  %v898_v4 = vld [vmem:[%s1223_s14 + $0x20] sm:$0xff]  ;;  %v897_v5 = vld [vmem:[%s1223_s14 + $0x18] sm:$0xff]  ;;  %v896_v6 = vld [vmem:[%s1223_s14 + $0x10] sm:$0xff] }
  0x41   : > { %903 = vmatpush.bf16.msra.mxu2 %v901_v1  ;;  %904 = vmatpush.bf16.msra.mxu3 %v901_v1  ;;  %v895_v7 = vld [vmem:[%s1223_s14 + $0x8] sm:$0xff]  ;;  %v894_v8 = vld [vmem:[%s1223_s14] sm:$0xff]  ;;  %v888_v10 = vld [vmem:[%s1212_s11 + $0x10] sm:$0xff] }
  0x42   : > { %v886_v9 = vld [vmem:[%s1212_s11] sm:$0xff]  ;;  %v892_v12 = vld [vmem:[%s1212_s11 + $0x30] sm:$0xff]  ;;  %v887_v13 = vld [vmem:[%s1212_s11 + $0x8] sm:$0xff] }
  0x43   : > { %v890_v11 = vld [vmem:[%s1212_s11 + $0x20] sm:$0xff]  ;;  %v889_v14 = vld [vmem:[%s1212_s11 + $0x18] sm:$0xff]  ;;  %v891_v15 = vld [vmem:[%s1212_s11 + $0x28] sm:$0xff] }
  0x44   : > { %426 = vmatpush.bf16.msra.mxu0 %v900_v2  ;;  %905 = vmatpush.bf16.msra.mxu1 %v900_v2  ;;  %v893_v16 = vld [vmem:[%s1212_s11 + $0x38] sm:$0xff]  ;;  %v281_v17 = vld [vmem:[#allocation2] sm:$0xff]  ;;  %v282_v25 = vld [vmem:[#allocation2 + $0x8] sm:$0xff] }
  0x45   : > { %906 = vmatpush.bf16.msra.mxu2 %v900_v2  ;;  %907 = vmatpush.bf16.msra.mxu3 %v900_v2  ;;  %v285_v18 = vld [vmem:[#allocation2 + $0x20] sm:$0xff]  ;;  %v286_v26 = vld [vmem:[#allocation2 + $0x28] sm:$0xff]  ;;  %v283_v37 = vld [vmem:[#allocation2 + $0x10] sm:$0xff] }
  0x46   : > { %v289_v23 = vld [vmem:[#allocation2 + $0x40] sm:$0xff]  ;;  %v290_v35 = vld [vmem:[#allocation2 + $0x48] sm:$0xff]  ;;  %v287_v38 = vld [vmem:[#allocation2 + $0x30] sm:$0xff] }
  0x47   : > { %v293_v24 = vld [vmem:[#allocation2 + $0x60] sm:$0xff]  ;;  %v294_v36 = vld [vmem:[#allocation2 + $0x68] sm:$0xff]  ;;  %v291_v47 = vld [vmem:[#allocation2 + $0x50] sm:$0xff] }
  0x48   : > { %427 = vmatpush.bf16.msra.mxu0 %v899_v3  ;;  %908 = vmatpush.bf16.msra.mxu1 %v899_v3  ;;  %v295_v48 = vld [vmem:[#allocation2 + $0x70] sm:$0xff]  ;;  %v284_v49 = vld [vmem:[#allocation2 + $0x18] sm:$0xff] }
  0x49   : > { %909 = vmatpush.bf16.msra.mxu2 %v899_v3  ;;  %910 = vmatpush.bf16.msra.mxu3 %v899_v3  ;;  %v288_v50 = vld [vmem:[#allocation2 + $0x38] sm:$0xff] }
  0x4a   : > { %v292_v59 = vld [vmem:[#allocation2 + $0x58] sm:$0xff] }
  0x4b   : > { %v296_v60 = vld [vmem:[#allocation2 + $0x78] sm:$0xff] }
  0x4c   : > { %428 = vmatpush.bf16.msra.mxu0 %v898_v4  ;;  %911 = vmatpush.bf16.msra.mxu1 %v898_v4 }
  0x4d   : > { %912 = vmatpush.bf16.msra.mxu2 %v898_v4  ;;  %913 = vmatpush.bf16.msra.mxu3 %v898_v4 }
  0x50   : > { %429 = vmatpush.bf16.msra.mxu0 %v897_v5  ;;  %914 = vmatpush.bf16.msra.mxu1 %v897_v5 }
  0x51   : > { %915 = vmatpush.bf16.msra.mxu2 %v897_v5  ;;  %916 = vmatpush.bf16.msra.mxu3 %v897_v5 }
  0x54   : > { %430 = vmatpush.bf16.msra.mxu0 %v896_v6  ;;  %917 = vmatpush.bf16.msra.mxu1 %v896_v6 }
  0x55   : > { %918 = vmatpush.bf16.msra.mxu2 %v896_v6  ;;  %919 = vmatpush.bf16.msra.mxu3 %v896_v6 }
  0x58   : > { %431 = vmatpush.bf16.msra.mxu0 %v895_v7  ;;  %920 = vmatpush.bf16.msra.mxu1 %v895_v7 }
  0x59   : > { %921 = vmatpush.bf16.msra.mxu2 %v895_v7  ;;  %922 = vmatpush.bf16.msra.mxu3 %v895_v7 }
  0x5c   : > { %432 = vmatpush.bf16.msra.mxu0 %v894_v8  ;;  %923 = vmatpush.bf16.msra.mxu1 %v894_v8 }
  0x5d   : > { %924 = vmatpush.bf16.msra.mxu2 %v894_v8  ;;  %925 = vmatpush.bf16.msra.mxu3 %v894_v8 }
  0x5f   : > { %433 = vmatmul.bf16.vlgmr.msra.gmra.mxu0 %v886_v9  ;;  %443 = vmatmul.bf16.vlgmr.msra.gmra.mxu1 %v888_v10 }
  0x60   : > { %453 = vmatmul.bf16.vlgmr.msra.gmra.mxu2 %v890_v11  ;;  %463 = vmatmul.bf16.vlgmr.msra.gmra.mxu3 %v892_v12 }
  0x6f   : > { %438 = vmatmul.bf16.gmra.mxu0 %v887_v13  ;;  %448 = vmatmul.bf16.gmra.mxu1 %v889_v14 }
  0x70   : > { %458 = vmatmul.bf16.gmra.mxu2 %v891_v15  ;;  %468 = vmatmul.bf16.gmra.mxu3 %v893_v16 }
  0xdc   : > { %v434_v19 = vpop.f32.mrf.mxu0  ;;  %v444_v20 = vpop.f32.mrf.mxu1 }
  0xdd   : > { %v474_v21 = vadd.f32 %v434_v19, %v281_v17  ;;  %v478_v22 = vadd.f32 %v444_v20, %v285_v18 }
  0xdf   : > { %491 = vst.msk [vmem:[#allocation2] sm:$0xff] %vm490_vm1, %v474_v21 }
  0xe0   : > { %495 = vst.msk [vmem:[#allocation2 + $0x20] sm:$0xff] %vm490_vm1, %v478_v22 }
  0xe3   : > { %v454_v27 = vpop.f32.mrf.mxu2  ;;  %v464_v28 = vpop.f32.mrf.mxu3 }
  0xe4   : > { %v482_v29 = vadd.f32 %v454_v27, %v289_v23  ;;  %v486_v30 = vadd.f32 %v464_v28, %v293_v24  ;;  %v436_v31 = vpop.f32.mrf.mxu0  ;;  %v446_v32 = vpop.f32.mrf.mxu1 }
  0xe5   : > { %v475_v33 = vadd.f32 %v436_v31, %v282_v25  ;;  %v479_v34 = vadd.f32 %v446_v32, %v286_v26 }
  0xe6   : > { %499 = vst.msk [vmem:[#allocation2 + $0x40] sm:$0xff] %vm490_vm1, %v482_v29 }
  0xe7   : > { %503 = vst.msk [vmem:[#allocation2 + $0x60] sm:$0xff] %vm490_vm1, %v486_v30 }
  0xe8   : > { %492 = vst.msk [vmem:[#allocation2 + $0x8] sm:$0xff] %vm490_vm1, %v475_v33 }
  0xe9   : > { %496 = vst.msk [vmem:[#allocation2 + $0x28] sm:$0xff] %vm490_vm1, %v479_v34 }
  0xeb   : > { %v456_v39 = vpop.f32.mrf.mxu2  ;;  %v466_v40 = vpop.f32.mrf.mxu3 }
  0xec   : > { %v483_v41 = vadd.f32 %v456_v39, %v290_v35  ;;  %v487_v42 = vadd.f32 %v466_v40, %v294_v36  ;;  %v439_v43 = vpop.f32.mrf.mxu0  ;;  %v449_v44 = vpop.f32.mrf.mxu1 }
  0xed   : > { %v476_v45 = vadd.f32 %v439_v43, %v283_v37  ;;  %v480_v46 = vadd.f32 %v449_v44, %v287_v38 }
  0xee   : > { %500 = vst.msk [vmem:[#allocation2 + $0x48] sm:$0xff] %vm490_vm1, %v483_v41 }
  0xef   : > { %504 = vst.msk [vmem:[#allocation2 + $0x68] sm:$0xff] %vm490_vm1, %v487_v42 }
  0xf0   : > { %493 = vst.msk [vmem:[#allocation2 + $0x10] sm:$0xff] %vm490_vm1, %v476_v45 }
  0xf1   : > { %497 = vst.msk [vmem:[#allocation2 + $0x30] sm:$0xff] %vm490_vm1, %v480_v46 }
  0xf3   : > { %v459_v51 = vpop.f32.mrf.mxu2  ;;  %v469_v52 = vpop.f32.mrf.mxu3 }
  0xf4   : > { %v484_v53 = vadd.f32 %v459_v51, %v291_v47  ;;  %v488_v54 = vadd.f32 %v469_v52, %v295_v48  ;;  %v441_v55 = vpop.f32.mrf.mxu0  ;;  %v451_v56 = vpop.f32.mrf.mxu1 }
  0xf5   : > { %v477_v57 = vadd.f32 %v441_v55, %v284_v49  ;;  %v481_v58 = vadd.f32 %v451_v56, %v288_v50 }
  0xf6   : > { %501 = vst.msk [vmem:[#allocation2 + $0x50] sm:$0xff] %vm490_vm1, %v484_v53 }
  0xf7   : > { %505 = vst.msk [vmem:[#allocation2 + $0x70] sm:$0xff] %vm490_vm1, %v488_v54 }
  0xf8   : > { %494 = vst.msk [vmem:[#allocation2 + $0x18] sm:$0xff] %vm490_vm1, %v477_v57 }
  0xf9   : > { %498 = vst.msk [vmem:[#allocation2 + $0x38] sm:$0xff] %vm490_vm1, %v481_v58 }
  0xfb   : > { %v461_v61 = vpop.f32.mrf.mxu2  ;;  %v471_v62 = vpop.f32.mrf.mxu3  ;;  %510 = sbr.rel (%p866_p3) target bundleno = 422 (0x1a6), region = 48 }
  0xfc   : > { %v485_v63 = vadd.f32 %v461_v61, %v292_v59  ;;  %v489_v0 = vadd.f32 %v471_v62, %v296_v60 }
  0xfe   : > { %502 = vst.msk [vmem:[#allocation2 + $0x58] sm:$0xff] %vm490_vm1, %v485_v63 }
  0xff   : > { %506 = vst.msk [vmem:[#allocation2 + $0x78] sm:$0xff] %vm490_vm1, %v489_v0 }
 0x100   : > { %v527_v1 = vld [vmem:[%s1378_s2] sm:$0xff]  ;;  %v520_v6 = vld [vmem:[#allocation2 + $0x48] sm:$0xff]  ;;  %v521_v10 = vld [vmem:[#allocation2 + $0x50] sm:$0xff]  ;;  %vm677_vm2 = vcmask 125952  }
 0x101   : > { %v519_v2 = vld [vmem:[#allocation2 + $0x40] sm:$0xff]  ;;  %927 = vmatpush.msra.mxu2 %v527_v1  ;;  %928 = vmatpush.msra.mxu3 %v527_v1  ;;  %v524_v7 = vld [vmem:[#allocation2 + $0x68] sm:$0xff]  ;;  %v525_v11 = vld [vmem:[#allocation2 + $0x70] sm:$0xff] }
 0x102   : > { %v523_v3 = vld [vmem:[#allocation2 + $0x60] sm:$0xff]  ;;  %875 = vmatmul.msk.f32.vlgmr.msra.gmra.mxu2 %vm490_vm1, %v519_v2  ;;  %595 = vmatpush.msra.mxu0 %v527_v1  ;;  %v512_v8 = vld [vmem:[#allocation2 + $0x8] sm:$0xff]  ;;  %v513_v12 = vld [vmem:[#allocation2 + $0x10] sm:$0xff] }
 0x103   : > { %v511_v4 = vld [vmem:[#allocation2] sm:$0xff]  ;;  %879 = vmatmul.msk.f32.vlgmr.msra.gmra.mxu3 %vm490_vm1, %v523_v3  ;;  %926 = vmatpush.msra.mxu1 %v527_v1  ;;  %v516_v9 = vld [vmem:[#allocation2 + $0x28] sm:$0xff]  ;;  %v517_v13 = vld [vmem:[#allocation2 + $0x30] sm:$0xff] }
 0x104   : > { %v515_v5 = vld [vmem:[#allocation2 + $0x20] sm:$0xff]  ;;  %867 = vmatmul.msk.f32.vlgmr.msra.gmra.mxu0 %vm490_vm1, %v511_v4  ;;  %v514_v16 = vld [vmem:[#allocation2 + $0x18] sm:$0xff] }
 0x105   : > { %871 = vmatmul.msk.f32.vlgmr.msra.gmra.mxu1 %vm490_vm1, %v515_v5  ;;  %v522_v14 = vld [vmem:[#allocation2 + $0x58] sm:$0xff]  ;;  %v1302_v18 = vld [vmem:[%s1379_s3] ss:$0 sm:$0xff] }
 0x106   : > { %v526_v15 = vld [vmem:[#allocation2 + $0x78] sm:$0xff] }
 0x107   : > { %v518_v17 = vld [vmem:[#allocation2 + $0x38] sm:$0xff] }
 0x10a   : > { %876 = vmatmul.msk.f32.gmra.mxu2 %vm490_vm1, %v520_v6 }
 0x10b   : > { %880 = vmatmul.msk.f32.gmra.mxu3 %vm490_vm1, %v524_v7 }
 0x10c   : > { %868 = vmatmul.msk.f32.gmra.mxu0 %vm490_vm1, %v512_v8 }
 0x10d   : > { %872 = vmatmul.msk.f32.gmra.mxu1 %vm490_vm1, %v516_v9 }
 0x112   : > { %877 = vmatmul.msk.f32.gmra.mxu2 %vm490_vm1, %v521_v10 }
 0x113   : > { %881 = vmatmul.msk.f32.gmra.mxu3 %vm490_vm1, %v525_v11 }
 0x114   : > { %869 = vmatmul.msk.f32.gmra.mxu0 %vm490_vm1, %v513_v12 }
 0x115   : > { %873 = vmatmul.msk.f32.gmra.mxu1 %vm490_vm1, %v517_v13 }
 0x11a   : > { %878 = vmatmul.msk.f32.gmra.mxu2 %vm490_vm1, %v522_v14 }
 0x11b   : > { %882 = vmatmul.msk.f32.gmra.mxu3 %vm490_vm1, %v526_v15 }
 0x11c   : > { %870 = vmatmul.msk.f32.gmra.mxu0 %vm490_vm1, %v514_v16 }
 0x11d   : > { %874 = vmatmul.msk.f32.gmra.mxu1 %vm490_vm1, %v518_v17 }
 0x181   : > { %v597_v19 = vpop.f32.mrf.mxu0 }
 0x182   : > { %v609_v20 = vpop.f32.mrf.mxu1  ;;  %v598_v21 = vadd.f32 %v1302_v18, %v597_v19 }
 0x183   : > { %v610_v22 = vadd.f32 %v1302_v18, %v609_v20 }
 0x184   : > { %v645_v23 = vmax.f32 %v598_v21, 0.0 }
 0x185   : > { %v649_v24 = vmax.f32 %v610_v22, 0.0  ;;  %v621_v25 = vpop.f32.mrf.mxu2 }
 0x186   : > { %v633_v26 = vpop.f32.mrf.mxu3  ;;  %v661_v27 = vpack.c.bf16 %v645_v23, %v645_v23  ;;  %v622_v29 = vadd.f32 %v1302_v18, %v621_v25 }
 0x187   : > { %v665_v28 = vpack.c.bf16 %v649_v24, %v649_v24  ;;  %v634_v30 = vadd.f32 %v1302_v18, %v633_v26 }
 0x188   : > { %678 = vst.msk [vmem:[%s1228_s29] sm:$0xf] %vm677_vm2, %v661_v27  ;;  %v653_v31 = vmax.f32 %v622_v29, 0.0 }
 0x189   : > { %v657_v32 = vmax.f32 %v634_v30, 0.0  ;;  %682 = vst.msk [vmem:[%s1228_s29 + $0x10] sm:$0xf] %vm677_vm2, %v665_v28  ;;  %v600_v33 = vpop.f32.mrf.mxu0 }
 0x18a   : > { %v612_v34 = vpop.f32.mrf.mxu1  ;;  %v669_v35 = vpack.c.bf16 %v653_v31, %v653_v31  ;;  %v601_v37 = vadd.f32 %v1302_v18, %v600_v33 }
 0x18b   : > { %v673_v36 = vpack.c.bf16 %v657_v32, %v657_v32  ;;  %v613_v38 = vadd.f32 %v1302_v18, %v612_v34 }
 0x18c   : > { %686 = vst.msk [vmem:[%s1228_s29 + $0x20] sm:$0xf] %vm677_vm2, %v669_v35  ;;  %v646_v39 = vmax.f32 %v601_v37, 0.0 }
 0x18d   : > { %v650_v40 = vmax.f32 %v613_v38, 0.0  ;;  %690 = vst.msk [vmem:[%s1228_s29 + $0x30] sm:$0xf] %vm677_vm2, %v673_v36  ;;  %v624_v41 = vpop.f32.mrf.mxu2 }
 0x18e   : > { %v636_v42 = vpop.f32.mrf.mxu3  ;;  %v662_v43 = vpack.c.bf16 %v646_v39, %v646_v39  ;;  %v625_v45 = vadd.f32 %v1302_v18, %v624_v41 }
 0x18f   : > { %v666_v44 = vpack.c.bf16 %v650_v40, %v650_v40  ;;  %v637_v46 = vadd.f32 %v1302_v18, %v636_v42 }
 0x190   : > { %679 = vst.msk [vmem:[%s1228_s29 + $0x4] sm:$0xf] %vm677_vm2, %v662_v43  ;;  %v654_v47 = vmax.f32 %v625_v45, 0.0 }
 0x191   : > { %v658_v48 = vmax.f32 %v637_v46, 0.0  ;;  %683 = vst.msk [vmem:[%s1228_s29 + $0x14] sm:$0xf] %vm677_vm2, %v666_v44  ;;  %v603_v49 = vpop.f32.mrf.mxu0 }
 0x192   : > { %v615_v50 = vpop.f32.mrf.mxu1  ;;  %v670_v51 = vpack.c.bf16 %v654_v47, %v654_v47  ;;  %v604_v53 = vadd.f32 %v1302_v18, %v603_v49 }
 0x193   : > { %v674_v52 = vpack.c.bf16 %v658_v48, %v658_v48  ;;  %v616_v54 = vadd.f32 %v1302_v18, %v615_v50 }
 0x194   : > { %687 = vst.msk [vmem:[%s1228_s29 + $0x24] sm:$0xf] %vm677_vm2, %v670_v51  ;;  %v647_v55 = vmax.f32 %v604_v53, 0.0 }
 0x195   : > { %v651_v56 = vmax.f32 %v616_v54, 0.0  ;;  %691 = vst.msk [vmem:[%s1228_s29 + $0x34] sm:$0xf] %vm677_vm2, %v674_v52  ;;  %v627_v57 = vpop.f32.mrf.mxu2 }
 0x196   : > { %v639_v58 = vpop.f32.mrf.mxu3  ;;  %v663_v59 = vpack.c.bf16 %v647_v55, %v647_v55  ;;  %v628_v61 = vadd.f32 %v1302_v18, %v627_v57 }
 0x197   : > { %v667_v60 = vpack.c.bf16 %v651_v56, %v651_v56  ;;  %v640_v62 = vadd.f32 %v1302_v18, %v639_v58 }
 0x198   : > { %680 = vst.msk [vmem:[%s1228_s29 + $0x8] sm:$0xf] %vm677_vm2, %v663_v59  ;;  %v655_v63 = vmax.f32 %v628_v61, 0.0 }
 0x199   : > { %v659_v0 = vmax.f32 %v640_v62, 0.0  ;;  %684 = vst.msk [vmem:[%s1228_s29 + $0x18] sm:$0xf] %vm677_vm2, %v667_v60  ;;  %v606_v1 = vpop.f32.mrf.mxu0 }
 0x19a   : > { %v618_v2 = vpop.f32.mrf.mxu1  ;;  %v671_v3 = vpack.c.bf16 %v655_v63, %v655_v63  ;;  %v607_v5 = vadd.f32 %v1302_v18, %v606_v1 }
 0x19b   : > { %v675_v4 = vpack.c.bf16 %v659_v0, %v659_v0  ;;  %v619_v6 = vadd.f32 %v1302_v18, %v618_v2 }
 0x19c   : > { %688 = vst.msk [vmem:[%s1228_s29 + $0x28] sm:$0xf] %vm677_vm2, %v671_v3  ;;  %v648_v7 = vmax.f32 %v607_v5, 0.0 }
 0x19d   : > { %v652_v8 = vmax.f32 %v619_v6, 0.0  ;;  %692 = vst.msk [vmem:[%s1228_s29 + $0x38] sm:$0xf] %vm677_vm2, %v675_v4  ;;  %v630_v9 = vpop.f32.mrf.mxu2 }
 0x19e   : > { %v642_v10 = vpop.f32.mrf.mxu3  ;;  %v664_v11 = vpack.c.bf16 %v648_v7, %v648_v7  ;;  %v631_v13 = vadd.f32 %v1302_v18, %v630_v9 }
 0x19f   : > { %v668_v12 = vpack.c.bf16 %v652_v8, %v652_v8  ;;  %v643_v14 = vadd.f32 %v1302_v18, %v642_v10 }
 0x1a0   : > { %681 = vst.msk [vmem:[%s1228_s29 + $0xc] sm:$0xf] %vm677_vm2, %v664_v11  ;;  %v656_v15 = vmax.f32 %v631_v13, 0.0 }
 0x1a1   : > { %v660_v16 = vmax.f32 %v643_v14, 0.0  ;;  %685 = vst.msk [vmem:[%s1228_s29 + $0x1c] sm:$0xf] %vm677_vm2, %v668_v12 }
 0x1a2   : > { %v672_v17 = vpack.c.bf16 %v656_v15, %v656_v15 }
 0x1a3   : > { %v676_v19 = vpack.c.bf16 %v660_v16, %v660_v16 }
 0x1a4   : > { %689 = vst.msk [vmem:[%s1228_s29 + $0x2c] sm:$0xf] %vm677_vm2, %v672_v17 }
 0x1a5   : > { %693 = vst.msk [vmem:[%s1228_s29 + $0x3c] sm:$0xf] %vm677_vm2, %v676_v19 }
 0x1a6 PF: > { %s17_s22 = sadd.s32 1, %s1101_s22   ;;  %s1385_s5 = sld [smem:[#allocation6_spill]] }
 0x1a7   : > { %p14_p4 = scmp.ge.s32.totalorder %s17_s22, 6   ;;  %s1386_s15 = smov %s1077_s16 }
 0x1a8   : > { %s1387_s16 = smov %s1081_s17  ;;  %s1388_s17 = smov %s1199_s9 }
 0x1a9   : > { %s1389_s18 = smov %s1093_s20  ;;  %s1390_s19 = smov %s1097_s21 }
 0x1aa   : > { %s1391_s20 = smov %s1394_s24  ;;  %16 = sbr.rel (!%p14_p4) target bundleno = 5 (0x5), region = 87 }
 0x1ac   : > { %s1392_s21 = smov %s1385_s5 }
 0x1af   :  { %716 = vsyncpa [#allocation4], 1 }
 0x1b0   :  { %718 = vsyncpa [#allocation4 + $0x1], 1 }

</bundles_post_ra>
